<compile_context>
chip_gen: v5e
topology: v5e:2x2
jax: 0.10.0
libtpu: 0.0.40
codegen_flags: <defaults>
</compile_context>

<pallas_src>
import math
import jax
import jax.numpy as jnp
from jax.experimental import pallas as pl
from jax.experimental.pallas import tpu as pltpu

_VMEM_LIMIT_BYTES = 48 << 20          # explicit scoped-VMEM limit (safe on v5e/v6e/v7x)
_MASK_FILL = -1e30                    # finite: fully-masked rows stay NaN-free


def _round_up(x, m):
    return ((x + m - 1) // m) * m


def gat_kernel(x_ref, bias_ref, wqkv_ref, bqkv_ref, wo_ref, bo_ref, out_ref):
    rows, C = x_ref.shape                         # rows = Bb * N (lane/sublane-dense slab)
    Bb, N, _ = bias_ref.shape
    Ep = wo_ref.shape[0]                          # padded head width (128-multiple)

    # Fused q/k/v projection: ONE (Bb*N, C) @ (C, 3*Ep) MXU pass, f32 accumulation.
    qkv = jnp.dot(x_ref[...], wqkv_ref[...],
                  preferred_element_type=jnp.float32) + bqkv_ref[...]      # [rows, 3*Ep] f32
    qkv_bf = qkv.astype(jnp.bfloat16)             # single cast; slices below are 128-aligned views
    q = qkv_bf[:, :Ep].reshape(Bb, N, Ep)         # attention scale already folded into weights
    k = qkv_bf[:, Ep:2 * Ep].reshape(Bb, N, Ep)
    v = qkv_bf[:, 2 * Ep:].reshape(Bb, N, Ep)

    # scores[b,i,j] = q[b,i,:] . k[b,j,:] -- transposed contraction, no k.T materialized.
    scores = jax.lax.dot_general(
        q, k, dimension_numbers=(((2,), (2,)), ((0,), (0,))),
        preferred_element_type=jnp.float32)                                 # [Bb, N, N] f32

    # Additive mask (0 / -1e30): one VPU add on the N^2 path instead of compare + select.
    scores = scores + bias_ref[...].astype(jnp.float32)

    # f32 online-softmax statistics; probabilities go to the MXU in bf16.
    m = jnp.max(scores, axis=-1, keepdims=True)
    e = jnp.exp(scores - m)                                                 # [Bb, N, N] f32
    l = jnp.sum(e, axis=-1, keepdims=True)                                  # [Bb, N, 1] f32

    ctx = jax.lax.dot_general(
        e.astype(jnp.bfloat16), v,
        dimension_numbers=(((2,), (1,)), ((0,), (0,))),
        preferred_element_type=jnp.float32)                                 # [Bb, N, Ep] f32
    # Normalize AFTER the matmul: N*Ep multiplies instead of N*N; reciprocal on the EUP slot.
    ctx = ctx * pl.reciprocal(l, approx=True)

    out = jnp.dot(ctx.reshape(rows, Ep).astype(jnp.bfloat16), wo_ref[...],
                  preferred_element_type=jnp.float32) + bo_ref[...]         # [rows, Eo] f32
    out_ref[...] = out.astype(out_ref.dtype)      # lane-dense (Eo is a 128-multiple) store


def _fold_params(p, scale, Ep, Eo):
    """Fold embedding Linear + MHA in-projection, fold the attention scale into Wq,
    pre-transpose, zero-pad each q/k/v segment (and the out-projection) to 128-lane
    multiples, and pack q/k/v into one [C, 3*Ep] bf16 slab."""
    E, C = p["wq"].shape
    wq_eff = (p["wqi"] @ p["wq"]) * scale                      # [E, C]
    wk_eff = p["wki"] @ p["wk"]
    wv_eff = p["wvi"] @ p["wv"]
    bq_eff = (p["bq"][0] @ p["wqi"].T + p["bqi"][0]) * scale   # [E]
    bk_eff = p["bk"][0] @ p["wki"].T + p["bki"][0]
    bv_eff = p["bv"][0] @ p["wvi"].T + p["bvi"][0]

    pad_w = lambda w_t: jnp.pad(w_t, ((0, 0), (0, Ep - E)))    # [C,E] -> [C,Ep]
    pad_b = lambda b: jnp.pad(b, (0, Ep - E))                  # [E]   -> [Ep]

    wqkv = jnp.concatenate([pad_w(wq_eff.T), pad_w(wk_eff.T), pad_w(wv_eff.T)], axis=1)  # [C, 3*Ep]
    bqkv = jnp.concatenate([pad_b(bq_eff), pad_b(bk_eff), pad_b(bv_eff)])[None, :]       # [1, 3*Ep]
    wo_t = jnp.pad(p["wo"].T, ((0, Ep - E), (0, Eo - E)))                                # [Ep, Eo]
    bo = jnp.pad(p["bo"], ((0, 0), (0, Eo - E)))                                         # [1, Eo]
    return (wqkv.astype(jnp.bfloat16), bqkv.astype(jnp.float32),
            wo_t.astype(jnp.bfloat16), bo.astype(jnp.float32))


def _pick_block_b(B, N, C, Ep, Eo, budget_bytes):
    """Largest batch tile Bb (divisor of B) whose per-step VMEM footprint fits the
    budget, preferring >= 2 grid steps so v7x megacore gets work. Tiles must keep the
    flattened row dim 8-aligned (or be the full array) for the (8,128) BlockSpec rule."""
    def footprint(bb):
        rows = bb * N
        blocks = 2 * (rows * C * 2 + bb * N * N * 2 + rows * Eo * 4)        # double-buffered in/out
        weights = 2 * (C * 3 * Ep * 2 + 3 * Ep * 4 + Ep * Eo * 2 + Eo * 4)  # resident params
        inter = rows * 3 * Ep * 6 + bb * N * N * 10 + rows * Ep * 4 + rows * Eo * 4
        return blocks + weights + inter

    divisors = [d for d in range(B, 0, -1) if B % d == 0]                   # descending
    legal = [d for d in divisors if d == B or (d * N) % 8 == 0]
    fitting = [d for d in legal if footprint(d) <= budget_bytes]
    if not fitting:
        return min(legal) if legal else 1          # nothing fits: smallest legal tile, best effort
    multi = [d for d in fitting if B // d >= 2]
    return multi[0] if multi else fitting[0]


def gat_forward(x, adj, p):
    """x: [B, N, C_in] float32, adj: [B, N, N] (1/True = edge). Returns [B, N, E] float32."""
    B, N, C = x.shape
    E = p["wq"].shape[0]
    Ep = _round_up(E, 128)        # padded q/k/v segment width (aligned lane slices)
    Eo = _round_up(E, 128)        # padded output width (lane-dense stores)
    scale = 1.0 / math.sqrt(E)

    wqkv, bqkv, wo_t, bo = _fold_params(p, scale, Ep, Eo)
    Bb = _pick_block_b(B, N, C, Ep, Eo, int(0.75 * _VMEM_LIMIT_BYTES))

    # Flatten (B, N) -> (B*N) at the pallas_call boundary: lane/sublane-dense 2D slabs,
    # no per-step relayout reshapes inside the kernel.
    x2d = x.reshape(B * N, C).astype(jnp.bfloat16)
    bias = jnp.where(adj > 0.5, 0.0, _MASK_FILL).astype(jnp.bfloat16)       # additive mask

    in_specs = [
        pl.BlockSpec((Bb * N, C), lambda b: (b, 0)),        # node encodings (flat rows)
        pl.BlockSpec((Bb, N, N), lambda b: (b, 0, 0)),      # additive adjacency bias
        pl.BlockSpec((C, 3 * Ep), lambda b: (0, 0)),        # fused qkv projection weights
        pl.BlockSpec((1, 3 * Ep), lambda b: (0, 0)),        # fused qkv bias
        pl.BlockSpec((Ep, Eo), lambda b: (0, 0)),           # out-proj weight (pre-transposed, padded)
        pl.BlockSpec((1, Eo), lambda b: (0, 0)),            # out-proj bias (padded)
    ]
    out_spec = pl.BlockSpec((Bb * N, Eo), lambda b: (b, 0))

    out2d = pl.pallas_call(
        gat_kernel,
        out_shape=jax.ShapeDtypeStruct((B * N, Eo), jnp.float32),
        grid_spec=pltpu.PrefetchScalarGridSpec(
            num_scalar_prefetch=0,
            grid=(B // Bb,),
            in_specs=in_specs,
            out_specs=out_spec,
        ),
        # Batch axis is embarrassingly parallel -> megacore sharding on v7x.
        compiler_params=pltpu.CompilerParams(
            dimension_semantics=("parallel",),
            vmem_limit_bytes=_VMEM_LIMIT_BYTES,
        ),
    )(x2d, bias, wqkv, bqkv, wo_t, bo)

    return out2d[:, :E].reshape(B, N, E)


def gat_reference(x, adj, p):
    """Pure-JAX f32 reference mirroring the PyTorch forward (unfused), for correctness."""
    q0 = x @ p["wq"].T + p["bq"][0]
    k0 = x @ p["wk"].T + p["bk"][0]
    v0 = x @ p["wv"].T + p["bv"][0]
    q = q0 @ p["wqi"].T + p["bqi"][0]
    k = k0 @ p["wki"].T + p["bki"][0]
    v = v0 @ p["wvi"].T + p["bvi"][0]
    E = q.shape[-1]
    scores = jnp.einsum("bnd,bmd->bnm", q, k) / math.sqrt(E)
    scores = jnp.where(adj > 0.5, scores, -jnp.inf)
    attn = jax.nn.softmax(scores, axis=-1)
    ctx = jnp.einsum("bnm,bmd->bnd", attn, v)
    return ctx @ p["wo"].T + p["bo"][0]


def init_params(key, in_channels, out_channels):
    ks = jax.random.split(key, 14)
    E, C = out_channels, in_channels
    s_lin = 1.0 / math.sqrt(C)
    s_att = 1.0 / math.sqrt(E)

    def u(k, shape, s):
        return jax.random.uniform(k, shape, jnp.float32, -s, s)

    return {
        # query/key/val embedding Linears
        "wq": u(ks[0], (E, C), s_lin), "bq": u(ks[1], (1, E), s_lin),
        "wk": u(ks[2], (E, C), s_lin), "bk": u(ks[3], (1, E), s_lin),
        "wv": u(ks[4], (E, C), s_lin), "bv": u(ks[5], (1, E), s_lin),
        # MultiheadAttention in-projection (in_proj_weight split into q/k/v)
        "wqi": u(ks[6], (E, E), s_att), "bqi": u(ks[7], (1, E), s_att),
        "wki": u(ks[8], (E, E), s_att), "bki": u(ks[9], (1, E), s_att),
        "wvi": u(ks[10], (E, E), s_att), "bvi": u(ks[11], (1, E), s_att),
        # MultiheadAttention out-projection
        "wo": u(ks[12], (E, E), s_att), "bo": u(ks[13], (1, E), s_att),
    }


if __name__ == "__main__":
    B, N, C_IN, C_OUT = 2, 8, 16, 32

    key = jax.random.PRNGKey(0)
    k_x, k_adj, k_p = jax.random.split(key, 3)

    x = jax.random.normal(k_x, (B, N, C_IN), jnp.float32)
    # Random adjacency; force self-loops so no attention row is fully masked
    # (fully-masked rows give NaN in PyTorch; this kernel returns uniform attention there).
    adj_bool = jax.random.bernoulli(k_adj, 0.5, (B, N, N))
    adj_bool = adj_bool | jnp.eye(N, dtype=bool)[None]
    adj = adj_bool.astype(jnp.float32)

    params = init_params(k_p, C_IN, C_OUT)

    out = jax.block_until_ready(gat_forward(x, adj, params))
    ref = gat_reference(x, adj, params)

    assert out.shape == (B, N, C_OUT)
    # bf16 MXU operands (f32 accumulation) + approx reciprocal: tolerance loosened accordingly.
    assert jnp.allclose(out, ref, rtol=2e-2, atol=2e-2), "mismatch vs. JAX reference"

    print("KERNEL_OK")
</pallas_src>

<mosaic_0001>
module attributes {stable_mosaic.version = 11 : i64} {
  func.func @gat_kernel(%arg0: i32, %arg1: memref<8x16xbf16, #tpu.memory_space<vmem>>, %arg2: memref<1x8x8xbf16, #tpu.memory_space<vmem>>, %arg3: memref<16x384xbf16, #tpu.memory_space<vmem>>, %arg4: memref<1x384xf32, #tpu.memory_space<vmem>>, %arg5: memref<128x128xbf16, #tpu.memory_space<vmem>>, %arg6: memref<1x128xf32, #tpu.memory_space<vmem>>, %arg7: memref<8x128xf32, #tpu.memory_space<vmem>>) attributes {dimension_semantics = [#tpu.dimension_semantics<parallel>], iteration_bounds = array<i64: 2>, scalar_prefetch = 0 : i64, scratch_operands = 0 : i64, tpu.core_type = #tpu.core_type<tc>, window_params = [{transform_indices = @transform_0, window_bounds = array<i64: 8, 16>}, {transform_indices = @transform_1, window_bounds = array<i64: 1, 8, 8>}, {pipeline_mode = #tpu.pipeline_mode<synchronous>, transform_indices = @transform_2, window_bounds = array<i64: 16, 384>}, {pipeline_mode = #tpu.pipeline_mode<synchronous>, transform_indices = @transform_3, window_bounds = array<i64: 1, 384>}, {pipeline_mode = #tpu.pipeline_mode<synchronous>, transform_indices = @transform_4, window_bounds = array<i64: 128, 128>}, {pipeline_mode = #tpu.pipeline_mode<synchronous>, transform_indices = @transform_5, window_bounds = array<i64: 1, 128>}, {transform_indices = @transform_6, window_bounds = array<i64: 8, 128>}]} {
    %c0 = arith.constant 0 : index
    %c0_0 = arith.constant 0 : index
    %0 = vector.load %arg1[%c0, %c0_0] : memref<8x16xbf16, #tpu.memory_space<vmem>>, vector<8x16xbf16>
    %c0_1 = arith.constant 0 : index
    %c0_2 = arith.constant 0 : index
    %1 = vector.load %arg3[%c0_1, %c0_2] : memref<16x384xbf16, #tpu.memory_space<vmem>>, vector<16x384xbf16>
    %cst = arith.constant dense<0.000000e+00> : vector<8x384xf32>
    %2 = tpu.matmul %0, %1, %cst {dimension_numbers = #tpu.dot_dimension_numbers<[1], [0], [0], [1], [0, 0, 1, 1], [], []>} : vector<8x16xbf16>, vector<16x384xbf16>, vector<8x384xf32> -> vector<8x384xf32>
    %c0_3 = arith.constant 0 : index
    %c0_4 = arith.constant 0 : index
    %3 = vector.load %arg4[%c0_3, %c0_4] : memref<1x384xf32, #tpu.memory_space<vmem>>, vector<1x384xf32>
    %4 = vector.broadcast %3 : vector<1x384xf32> to vector<8x384xf32>
    %5 = arith.addf %2, %4 : vector<8x384xf32>
    %6 = arith.truncf %5 : vector<8x384xf32> to vector<8x384xbf16>
    %7 = vector.extract_strided_slice %6 {offsets = [0, 0], sizes = [8, 128], strides = [1, 1]} : vector<8x384xbf16> to vector<8x128xbf16>
    %8 = vector.shape_cast %7 : vector<8x128xbf16> to vector<1x8x128xbf16>
    %9 = vector.extract_strided_slice %6 {offsets = [0, 128], sizes = [8, 128], strides = [1, 1]} : vector<8x384xbf16> to vector<8x128xbf16>
    %10 = vector.shape_cast %9 : vector<8x128xbf16> to vector<1x8x128xbf16>
    %11 = vector.extract_strided_slice %6 {offsets = [0, 256], sizes = [8, 128], strides = [1, 1]} : vector<8x384xbf16> to vector<8x128xbf16>
    %12 = vector.shape_cast %11 : vector<8x128xbf16> to vector<1x8x128xbf16>
    %cst_5 = arith.constant dense<0.000000e+00> : vector<1x8x8xf32>
    %13 = tpu.matmul %8, %10, %cst_5 {dimension_numbers = #tpu.dot_dimension_numbers<[2], [2], [1], [1], [0, 0, 0, 1, 1, 1], [0], [0]>} : vector<1x8x128xbf16>, vector<1x8x128xbf16>, vector<1x8x8xf32> -> vector<1x8x8xf32>
    %c0_6 = arith.constant 0 : index
    %c0_7 = arith.constant 0 : index
    %c0_8 = arith.constant 0 : index
    %14 = vector.load %arg2[%c0_6, %c0_7, %c0_8] : memref<1x8x8xbf16, #tpu.memory_space<vmem>>, vector<1x8x8xbf16>
    %15 = arith.extf %14 : vector<1x8x8xbf16> to vector<1x8x8xf32>
    %16 = arith.addf %13, %15 : vector<1x8x8xf32>
    %cst_9 = arith.constant dense<0xFF800000> : vector<1x8xf32>
    %17 = vector.multi_reduction <maximumf>, %16, %cst_9 [2] : vector<1x8x8xf32> to vector<1x8xf32>
    %18 = vector.shape_cast %17 : vector<1x8xf32> to vector<1x8x1xf32>
    %19 = vector.broadcast %18 : vector<1x8x1xf32> to vector<1x8x8xf32>
    %20 = arith.subf %16, %19 : vector<1x8x8xf32>
    %21 = math.exp %20 : vector<1x8x8xf32>
    %cst_10 = arith.constant dense<0.000000e+00> : vector<1x8xf32>
    %22 = vector.multi_reduction <add>, %21, %cst_10 [2] : vector<1x8x8xf32> to vector<1x8xf32>
    %23 = vector.shape_cast %22 : vector<1x8xf32> to vector<1x8x1xf32>
    %24 = arith.truncf %21 : vector<1x8x8xf32> to vector<1x8x8xbf16>
    %cst_11 = arith.constant dense<0.000000e+00> : vector<1x8x128xf32>
    %25 = tpu.matmul %24, %12, %cst_11 {dimension_numbers = #tpu.dot_dimension_numbers<[2], [1], [1], [2], [0, 0, 0, 1, 1, 2], [0], [0]>} : vector<1x8x8xbf16>, vector<1x8x128xbf16>, vector<1x8x128xf32> -> vector<1x8x128xf32>
    %26 = tpu.reciprocal %23 {approx = true} : vector<1x8x1xf32> -> vector<1x8x1xf32>
    %27 = vector.broadcast %26 : vector<1x8x1xf32> to vector<1x8x128xf32>
    %28 = arith.mulf %25, %27 : vector<1x8x128xf32>
    %29 = vector.shape_cast %28 : vector<1x8x128xf32> to vector<8x128xf32>
    %30 = arith.truncf %29 : vector<8x128xf32> to vector<8x128xbf16>
    %c0_12 = arith.constant 0 : index
    %c0_13 = arith.constant 0 : index
    %31 = vector.load %arg5[%c0_12, %c0_13] : memref<128x128xbf16, #tpu.memory_space<vmem>>, vector<128x128xbf16>
    %cst_14 = arith.constant dense<0.000000e+00> : vector<8x128xf32>
    %32 = tpu.matmul %30, %31, %cst_14 {dimension_numbers = #tpu.dot_dimension_numbers<[1], [0], [0], [1], [0, 0, 1, 1], [], []>} : vector<8x128xbf16>, vector<128x128xbf16>, vector<8x128xf32> -> vector<8x128xf32>
    %c0_15 = arith.constant 0 : index
    %c0_16 = arith.constant 0 : index
    %33 = vector.load %arg6[%c0_15, %c0_16] : memref<1x128xf32, #tpu.memory_space<vmem>>, vector<1x128xf32>
    %34 = vector.broadcast %33 : vector<1x128xf32> to vector<8x128xf32>
    %35 = arith.addf %32, %34 : vector<8x128xf32>
    %c0_17 = arith.constant 0 : index
    %c0_18 = arith.constant 0 : index
    %36 = vector.load %arg7[%c0_17, %c0_18] : memref<8x128xf32, #tpu.memory_space<vmem>>, vector<8x128xf32>
    tpu.vector_store %arg7[%c0_17, %c0_18], %35 {strides = array<i32>} : memref<8x128xf32, #tpu.memory_space<vmem>>, vector<8x128xf32>,
    return
  }
  func.func @transform_0(%arg0: i32) -> (i32, i32) {
    %c0_i32 = arith.constant 0 : i32
    %c0_i32_0 = arith.constant 0 : i32
    return %arg0, %c0_i32 : i32, i32
  }
  func.func @transform_1(%arg0: i32) -> (i32, i32, i32) {
    %c0_i32 = arith.constant 0 : i32
    %c0_i32_0 = arith.constant 0 : i32
    %c0_i32_1 = arith.constant 0 : i32
    return %arg0, %c0_i32, %c0_i32_0 : i32, i32, i32
  }
  func.func @transform_2(%arg0: i32) -> (i32, i32) {
    %c0_i32 = arith.constant 0 : i32
    %c0_i32_0 = arith.constant 0 : i32
    %c0_i32_1 = arith.constant 0 : i32
    return %c0_i32, %c0_i32_0 : i32, i32
  }
  func.func @transform_3(%arg0: i32) -> (i32, i32) {
    %c0_i32 = arith.constant 0 : i32
    %c0_i32_0 = arith.constant 0 : i32
    %c0_i32_1 = arith.constant 0 : i32
    return %c0_i32, %c0_i32_0 : i32, i32
  }
  func.func @transform_4(%arg0: i32) -> (i32, i32) {
    %c0_i32 = arith.constant 0 : i32
    %c0_i32_0 = arith.constant 0 : i32
    %c0_i32_1 = arith.constant 0 : i32
    return %c0_i32, %c0_i32_0 : i32, i32
  }
  func.func @transform_5(%arg0: i32) -> (i32, i32) {
    %c0_i32 = arith.constant 0 : i32
    %c0_i32_0 = arith.constant 0 : i32
    %c0_i32_1 = arith.constant 0 : i32
    return %c0_i32, %c0_i32_0 : i32, i32
  }
  func.func @transform_6(%arg0: i32) -> (i32, i32) {
    %c0_i32 = arith.constant 0 : i32
    %c0_i32_0 = arith.constant 0 : i32
    return %arg0, %c0_i32 : i32, i32
  }
}

</mosaic_0001>

<bundles_post_ra>
// kernel: tpu_custom_call.1
= control target key start
LH: loop header
LB: loop body
LE: loop exit
PB: predicated region body
PF: predicated region fallthrough
CT: control target
= control target key end

     0   :  { %s1339_s0 = inlined_call_operand.hbm [shape: bf16[16,16], index: 0, kind: input, shape index: {}]   ;;  %s1340_s1 = inlined_call_operand.hbm [shape: bf16[2,8,8], index: 1, kind: input, shape index: {}]   ;;  %s1341_s2 = inlined_call_operand.hbm [shape: bf16[16,384], index: 2, kind: input, shape index: {}]   ;;  %s1342_s3 = inlined_call_operand.hbm [shape: f32[1,384], index: 3, kind: input, shape index: {}]   ;;  %s1343_s4 = inlined_call_operand.hbm [shape: bf16[128,128], index: 4, kind: input, shape index: {}]   ;;  %s1344_s5 = inlined_call_operand.vmem [shape: f32[1,128], index: 5, kind: input, shape index: {}]   ;;  %s1345_s6 = inlined_call_operand.hbm [shape: f32[16,128], index: 6, kind: output, shape index: {}]  }
   0x1   :  { %1347 = sst [smem:[#allocation19_spill]] %s1341_s2 }
   0x2   :  { %1348 = sst [smem:[#allocation20_spill]] %s1342_s3 }
   0x3   :  { %1349 = sst [smem:[#allocation21_spill]] %s1343_s4 }
   0x4   :  { %11 = vsyncpa [#allocation3], 0 }
   0x5   :  { %13 = vsyncpa [#allocation3 + $0x1], 0 }
   0x6   :  { %14 = vsyncpa [#allocation6], 0 }
   0x7   :  { %16 = vsyncpa [#allocation6 + $0x1], 0 }
   0x8   :  { %17 = vsyncpa [#allocation9], 0 }
   0x9   :  { %18 = vsyncpa [#allocation4], 0 }
   0xa   :  { %20 = vsyncpa [#allocation4 + $0x1], 0  ;;  %s1144_s21 = smov 0   ;;  %s1146_s22 = smov 0  }
   0xb   :  { %s1148_s23 = smov 0   ;;  %s1150_s24 = smov 0  }
   0xc LB: > { %1350 = sst [smem:[#allocation17_spill]] %s1096_s23  ;;  %s1168_s28 = sadd.s32 4294967295, %s1100_s24   ;;  %s1100_s24 = sphi %s1150_s24, %s1367_s24   ;;  %s1096_s23 = sphi %s1148_s23, %s1364_s23   ;;  %s1092_s22 = sphi %s1146_s22, %s1366_s22   ;;  %s1088_s21 = sphi %s1144_s21, %s1365_s21  }
   0xd   : > { %s1351_s2 = sld [smem:[#allocation19_spill]]  ;;  %p702_p0 = scmp.ge.s32.totalorder %s1100_s24, 1 }
   0xe   : > { %p47_p1 = scmp.eq.s32.totalorder %s1168_s28, 0  ;;  %p193_p2 = scmp.lt.s32.totalorder %s1100_s24, 3 }
   0xf   : > { %s1102_s30 = smov [#allocation7]   ;;  %s1353_s3 = sld [smem:[#allocation20_spill]] }
  0x10   : > { %p1173_p3 = pnand %p702_p0, %p193_p2  ;;  %s206_s7 = sshll.u32 %s1102_s30, 4  ;;  %s207_s7 = int_to_ptr.vmem [resolvable:$true] %s206_s7 }
  0x11   : > { %s1355_s4 = sld [smem:[#allocation21_spill]]  ;;  %s1103_s15 = smov [#allocation8]  }
  0x12   : > { %p799_p4 = pneg %p1173_p3  ;;  %s221_s16 = sshll.u32 %s1103_s15, 4  ;;  %s222_s16 = int_to_ptr.vmem [resolvable:$true] %s221_s16 }
  0x13   : > { %s204_s27 = sshll.u32 %s1351_s2, 4  ;;  %s1104_s17 = smov 192   ;;  %s205_s27 = int_to_ptr.hbm [resolvable:$true] %s204_s27 }
  0x14   : > { %p1185_p6 = pnand %p799_p4, %p47_p1  ;;  %s1105_s18 = smov 12  }
  0x15   : > { %s219_s10 = sshll.u32 %s1353_s3, 4  ;;  %s1106_s19 = smov [#allocation10]   ;;  %s220_s10 = int_to_ptr.hbm [resolvable:$true] %s219_s10 }
  0x16   : > { %802 = dma.hbm_to_vmem [thread:$0]  (!%p1185_p6), %s205_s27, 384, %s207_s7, [#allocation6], %s1104_s17, %s1104_s17, %s1105_s18  }
  0x17   : > { %s230_s14 = sshll.u32 %s1355_s4, 4  ;;  %s232_s20 = sshll.u32 %s1106_s19, 4  ;;  %s231_s14 = int_to_ptr.hbm [resolvable:$true] %s230_s14  ;;  %s233_s20 = int_to_ptr.vmem [resolvable:$true] %s232_s20 }
  0x18   : > { %805 = dma.hbm_to_vmem [thread:$0]  (!%p1185_p6), %s220_s10, 48, %s222_s16, [#allocation9]  }
  0x19   : > { %s1107_s25 = smov 64   ;;  %s1108_s26 = smov 4  }
  0x1a   : > { %808 = dma.hbm_to_vmem [thread:$0]  (!%p1185_p6), %s231_s14, 1024, %s233_s20, [#allocation9], %s1107_s25, %s1107_s25, %s1108_s26  }
  0x1b   : > { %s701_s27 = sadd.s32 4294967294, %s1100_s24   ;;  %s1200_s30 = sadd.s32 1, %s1100_s24  }
  0x1c   : > { %s33_s7 = sadd.s32 1, %s1096_s23  ;;  %s30_s8 = ssub.s32 %s1100_s24, %s1200_s30 }
  0x1d   : > { %p40_p7 = scmp.ne.s32.totalorder %s1096_s23, %s1092_s22  ;;  %p31_p8 = scmp.eq.s32.totalorder %s30_s8, 0 }
  0x1e   : > { %p41_p9 = scmp.eq.s32.totalorder %s1100_s24, 0  ;;  %p46_p10 = scmp.ne.s32.totalorder %s1092_s22, %s1088_s21 }
  0x1f   : > { %p180_p11 = scmp.eq.s32.totalorder %s1168_s28, 1  ;;  %p186_p2 = scmp.eq.s32.totalorder %s701_s27, 1 }
  0x20   : > { %s1212_s9 = scalar_select %p31_p8, %s1096_s23, %s33_s7  }
  0x21   : > { %p1214_p12 = por %p41_p9, %p40_p7  ;;  %p1220_p13 = por %p47_p1, %p46_p10 }
  0x22   : > { %1356 = sst [smem:[#allocation18_spill]] %s1212_s9  ;;  %p1224_p0 = por %p180_p11, %p40_p7 }
  0x23   : > { %p823_p4 = scmp.lt.s32.totalorder %s1100_s24, 2  ;;  %s249_s13 = sand.u32 1, %s1096_s23  }
  0x24   : > { %p1230_p6 = por %p186_p2, %p46_p10  ;;  %s707_s15 = sshll.u32 %s249_s13, 2 }
  0x25   : > { %s708_s16 = sshll.u32 %s1100_s24, 2  ;;  %s253_s25 = scalar_lea.vmem [#allocation2], %s707_s15 }
  0x26   : > { %s257_s19 = scalar_lea.hbm %s1339_s0, %s708_s16  ;;  %s261_s26 = sshll.u32 %s253_s25, 4  ;;  %s262_s26 = int_to_ptr.vmem [resolvable:$true] %s261_s26 }
  0x27   : > { %s259_s20 = sshll.u32 %s257_s19, 4  ;;  %p1240_p7 = pnand %p823_p4, %p1214_p12  ;;  %s260_s20 = int_to_ptr.hbm [resolvable:$true] %s259_s20 }
  0x28   : > { %s276_s2 = scalar_lea.hbm %s1340_s1, %s708_s16  ;;  %s268_s3 = sand.u32 1, %s1100_s24  }
  0x29   : > { %s250_s4 = scalar_lea.sflag [#allocation3], %s249_s13  ;;  %s962_s17 = sshra.s32 %s260_s20, 4  ;;  %s963_s17 = int_to_ptr.hbm [resolvable:$true] %s962_s17 }
  0x2a   : > { %s964_s18 = scalar_lea.hbm %s963_s17, 4  ;;  %p966_p9 = pneg %p1240_p7 }
  0x2b   : > { %p965_p8 = scmp.ne.s32.totalorder %s963_s17, %s964_s18  ;;  %s969_s25 = scalar_lea.hbm %s1339_s0, 8 }
  0x2c   : > { %p970_p12 = scmp.lt.s32.totalorder %s963_s17, %s1339_s0  ;;  %p971_p2 = scmp.lt.s32.totalorder %s969_s25, %s964_s18 }
  0x2d   : > { %p967_p10 = pnand %p966_p9, %p965_p8 }
  0x2e   : > { %p972_p4 = por %p971_p2, %p970_p12 }
  0x2f   : > { %p968_p11 = pneg %p967_p10 }
  0x31   : > { %p973_p5 = pnand %p972_p4, %p968_p11 }
  0x33   : > { %976 = shalt.err (!%p973_p5)
}
  0x34   : > { %812 = dma.hbm_to_vmem [thread:$0]  (!%p1240_p7), %s260_s20, 64, %s262_s26, %s250_s4  }
  0x35   : > { %s278_s13 = sshll.u32 %s276_s2, 4  ;;  %s272_s16 = scalar_lea.vmem [#allocation5], %s707_s15  ;;  %s279_s13 = int_to_ptr.hbm [resolvable:$true] %s278_s13 }
  0x36   : > { %s280_s9 = sshll.u32 %s272_s16, 4  ;;  %s269_s23 = scalar_lea.sflag [#allocation6], %s268_s3  ;;  %s281_s9 = int_to_ptr.vmem [resolvable:$true] %s280_s9 }
  0x37   : > { %s992_s10 = sshra.s32 %s279_s13, 4  ;;  %s999_s25 = scalar_lea.hbm %s1340_s1, 8  ;;  %s993_s10 = int_to_ptr.hbm [resolvable:$true] %s992_s10 }
  0x38   : > { %s994_s19 = scalar_lea.hbm %s993_s10, 4  ;;  %p1000_p5 = scmp.lt.s32.totalorder %s993_s10, %s1340_s1 }
  0x39   : > { %p995_p8 = scmp.ne.s32.totalorder %s993_s10, %s994_s19  ;;  %p1001_p11 = scmp.lt.s32.totalorder %s999_s25, %s994_s19 }
  0x3b   : > { %p997_p10 = pnand %p995_p8, %p966_p9  ;;  %p1002_p2 = por %p1001_p11, %p1000_p5 }
  0x3d   : > { %p998_p12 = pneg %p997_p10 }
  0x3f   : > { %p1003_p4 = pnand %p1002_p2, %p998_p12 }
  0x41   : > { %1006 = shalt.err (!%p1003_p4)
}
  0x42   : > { %815 = dma.hbm_to_vmem [thread:$0]  (!%p1240_p7), %s279_s13, 64, %s281_s9, %s269_s23  }
  0x43   : > { %289 = sbr.rel (%p1173_p3) target bundleno = 760 (0x2f8), region = 44  ;;  %s1275_s2 = sand.u32 (!%p1173_p3), 1, %s1092_s22  }
  0x44   : > { %s712_s3 = sshll.u32 (!%p1173_p3), %s1275_s2, 2  ;;  %s292_s15 = scalar_lea.sflag (!%p1173_p3), [#allocation3], %s1275_s2 }
  0x45   : > { %s295_s20 = scalar_lea.vmem (!%p1173_p3), [#allocation2], %s712_s3 }
  0x48   : > { %1067 = dma.done.wait (%p1220_p13), %s292_s15, 64  }
  0x49   : > { %1069 = vsyncadd (%p1220_p13), %s292_s15, 4294967232  ;;  %s301_s23 = sand.u32 1, %s1168_s28   ;;  %s1284_s29 = scalar_lea.vmem [#allocation5], %s712_s3 }
  0x4a   : > { %s302_s9 = scalar_lea.sflag [#allocation6], %s301_s23 }
  0x4b   : > { %1071 = dma.done.wait (%p1220_p13), %s302_s9, 64  }
  0x4c   : > { %1073 = vsyncadd (%p1220_p13), %s302_s9, 4294967232 }
  0x4d   : > { %1075 = dma.done.wait (%p47_p1), [#allocation6], 384  }
  0x4e   : > { %1077 = vsyncadd (%p47_p1), [#allocation6], 4294966912 }
  0x4f   : > { %1079 = dma.done.wait (%p47_p1), [#allocation9], 1072  }
  0x50   : > { %1081 = vsyncadd (%p47_p1), [#allocation9], 4294966224  ;;  %v720_v0 = vld [vmem:[#allocation7] sm:$0xf]  ;;  %v771_v1 = vld [vmem:[#allocation7 + $0x8] sm:$0xf0] }
  0x51   : > { %v770_v2 = vld [vmem:[#allocation7 + $0x4] sm:$0xf]  ;;  %v721_v3 = vor.u32 %v771_v1, %v720_v0  ;;  %v722_v4 = vld [vmem:[#allocation7 + $0xc] sm:$0xf0]  ;;  %vm385_vm0 = vcmask 130048   ;;  %vm462_vm1 = vcmask 1043456  }
  0x52   : > { %v725_v5 = vor.u32 %v770_v2, %v722_v4  ;;  %v356_v6 = vld [vmem:[%s295_s20] sm:$0xf]  ;;  %v728_v7 = vld [vmem:[#allocation7 + $0x8] sm:$0xf]  ;;  %v361_v10 = vld [vmem:[#allocation8] sm:$0x7] }
  0x53   : > { %396 = vmatpush.bf16.msra.mxu0 %v721_v3  ;;  %v772_v8 = vld [vmem:[#allocation7 + $0x10] sm:$0xf0]  ;;  %v363_v12 = vperm.slane %v361_v10, 0  ;;  %v364_v13 = vperm.slane %v361_v10, 1  ;;  %v365_v21 = vperm.slane %v361_v10, 2  ;;  %vm448_vm2 = vcmask 64512  }
  0x54   : > { %409 = vmatpush.bf16.msra.mxu2 %v725_v5  ;;  %v729_v9 = vor.u32 %v772_v8, %v728_v7  ;;  %v433_v27 = vld [vmem:[%s1284_s29] sm:$0xf]  ;;  %v779_v34 = vld [vmem:[#allocation10 + $0x30] sm:$0xff]  ;;  %v778_v35 = vld [vmem:[#allocation10 + $0x28] sm:$0xff]  ;;  %s767_s11 = sshll.u32 %s1168_s28, 3  ;;  %s717_s26 = sshll.u32 %s1275_s2, 3 }
  0x55   : > { %v434_v28 = vunpack.c.l.bf16 %v433_v27  ;;  %v780_v33 = vld [vmem:[#allocation10 + $0x38] sm:$0xff]  ;;  %v777_v36 = vld [vmem:[#allocation10 + $0x20] sm:$0xff]  ;;  %v775_v44 = vld [vmem:[#allocation10 + $0x10] sm:$0xff]  ;;  %s575_s13 = scalar_lea.hbm %s1345_s6, %s767_s11  ;;  %s354_s19 = scalar_lea.vmem [#allocation11], %s717_s26 }
  0x56   : > { %730 = vmatmul.msk.bf16.vlgmr.msra.gmra.mxu0 %vm385_vm0, %v356_v6  ;;  %550 = vmatpush.bf16.msra.mxu1 %v780_v33  ;;  %v776_v43 = vld [vmem:[#allocation10 + $0x18] sm:$0xff]  ;;  %v774_v45 = vld [vmem:[#allocation10 + $0x8] sm:$0xff]  ;;  %v773_v46 = vld [vmem:[#allocation10] sm:$0xff]  ;;  %s577_s17 = sshll.u32 %s354_s19, 4  ;;  %s579_s18 = sshll.u32 %s575_s13, 4  ;;  %s578_s17 = int_to_ptr.vmem [resolvable:$true] %s577_s17  ;;  %s580_s18 = int_to_ptr.hbm [resolvable:$true] %s579_s18 }
  0x57   : > { %731 = vmatmul.msk.bf16.vlgmr.msra.gmra.mxu2 %vm385_vm0, %v356_v6  ;;  %v867_v53 = vld [vmem:[%s1344_s5] ss:$0 sm:$0xff]  ;;  %s565_s25 = scalar_lea.sflag [#allocation4], %s1275_s2  ;;  %s1036_s28 = sshra.s32 %s580_s18, 4  ;;  %s1037_s28 = int_to_ptr.hbm [resolvable:$true] %s1036_s28 }
  0x58   : > { %422 = vmatpush.bf16.msrb.mxu2 %v729_v9  ;;  %s1038_s7 = scalar_lea.hbm %s1037_s28, 8  ;;  %s1042_s15 = scalar_lea.hbm %s1345_s6, 16 }
  0x59   : > { %p1039_p1 = scmp.ne.s32.totalorder %s1037_s28, %s1038_s7  ;;  %p1043_p7 = scmp.lt.s32.totalorder %s1037_s28, %s1345_s6 }
  0x5a   : > { %551 = vmatpush.bf16.msra.mxu1 %v779_v34  ;;  %p1044_p9 = scmp.lt.s32.totalorder %s1042_s15, %s1038_s7 }
  0x5b   : > { %p1040_p3 = pnand %p1039_p1, %p1224_p0 }
  0x5c   : > { %p1045_p8 = por %p1044_p9, %p1043_p7 }
  0x5d   : > { %p1041_p13 = pneg %p1040_p3 }
  0x5e   : > { %552 = vmatpush.bf16.msra.mxu1 %v778_v35 }
  0x5f   : > { %p1046_p10 = pnand %p1045_p8, %p1041_p13 }
  0x62   : > { %553 = vmatpush.bf16.msra.mxu1 %v777_v36 }
  0x66   : > { %554 = vmatpush.bf16.msra.mxu1 %v776_v43 }
  0x67   : > { %732 = vmatmul.msk.bf16.vlgmr.msrb.gmra.mxu2 %vm385_vm0, %v356_v6 }
  0x6a   : > { %555 = vmatpush.bf16.msra.mxu1 %v775_v44 }
  0x6e   : > { %556 = vmatpush.bf16.msra.mxu1 %v774_v45 }
  0x72   : > { %557 = vmatpush.bf16.msra.mxu1 %v773_v46 }
  0xd3   : > { %v398_v11 = vpop.f32.mrf.mxu0 }
  0xd4   : > { %v399_v14 = vadd.f32 %v398_v11, %v363_v12 }
  0xda   : > { %v411_v15 = vpop.f32.mrf.mxu2 }
  0xdb   : > { %v412_v16 = vadd.f32 %v411_v15, %v364_v13  ;;  %v400_v17 = vpop.f32.mrf.mxu0 }
  0xdd   : > { %v428_v18 = vpack.c.bf16 %v412_v16, %v399_v14 }
  0xdf   : > { %v431_v19 = vrot.slane %v428_v18, 4 }
  0xe1   : > { %442 = vmatpush.bf16.xpose.msra.mxu3 %v431_v19 }
  0xe2   : > { %v413_v20 = vpop.f32.mrf.mxu2 }
  0xe8   : > { %443 = vmatmul.bf16.vlgmr.msra.gmra.mxu3 %v428_v18 }
  0xea   : > { %v424_v22 = vpop.f32.mrf.mxu2 }
  0xeb   : > { %v425_v23 = vadd.f32 %v424_v22, %v365_v21 }
  0xed   : > { %v429_v24 = vpack.c.bf16 %v425_v23, %v425_v23 }
  0xef   : > { %v464_v25 = vsel %vm462_vm1, %v429_v24, 0 }
  0xf0   : > { %473 = vmatpush.bf16.msrb.mxu0 %v464_v25 }
  0xf2   : > { %v426_v26 = vpop.f32.mrf.mxu2 }
 0x16b   : > { %v444_v29 = vpop.f32.mrf.mxu3 }
 0x16c   : > { %v445_v30 = vadd.f32 %v444_v29, %v434_v28 }
 0x16e   : > { %v449_v31 = vsel %vm448_vm2, %v445_v30, -inf }
 0x16f   : > { %450 = vmax.xlane.f32.xlu0 %v449_v31 }
 0x173   : > { %v446_v32 = vpop.f32.mrf.mxu3 }
 0x1e2   : > { %v451_v37 = vpop.xlane.xlu0 %450 }
 0x1e3   : > { %v452_v38 = vsub.f32 %v445_v30, %v451_v37 }
 0x1e5   : > { %v453_v39 = vmul.f32 1.442695, %v452_v38 }
 0x1e7   : > { %868 = vpow2.f32 %v453_v39 }
 0x1ed   : > { %v869_v40 = vpop.eup %868 }
 0x1ee   : > { %v455_v41 = vsel %vm448_vm2, %v869_v40, 0.0  ;;  %v458_v42 = vpack.c.bf16 %v869_v40, %v869_v40 }
 0x1ef   : > { %456 = vadd.xlane.f32.xlu0 %v455_v41 }
 0x1f0   : > { %733 = vmatmul.msk.bf16.vlgmr.msrb.gmra.mxu0 %vm448_vm2, %v458_v42 }
 0x262   : > { %v457_v47 = vpop.xlane.xlu0 %456 }
 0x263   : > { %870 = vrcp.f32 %v457_v47 }
 0x269   : > { %v871_v48 = vpop.eup %870 }
 0x26d   : > { %v475_v49 = vpop.f32.mrf.mxu0 }
 0x26e   : > { %v480_v50 = vmul.f32 %v871_v48, %v475_v49 }
 0x270   : > { %v481_v51 = vpack.c.bf16 %v480_v50, %v480_v50 }
 0x272   : > { %558 = vmatmul.bf16.vlgmr.msra.gmra.mxu1 %v481_v51 }
 0x275   : > { %v477_v52 = vpop.f32.mrf.mxu0 }
 0x2ef   : > { %v559_v54 = vpop.f32.mrf.mxu1 }
 0x2f0   : > { %v560_v55 = vadd.f32 %v867_v53, %v559_v54 }
 0x2f2   : > { %563 = vst [vmem:[%s354_s19] sm:$0xff] %v560_v55 }
 0x2f3   : > { %1049 = shalt.err (!%p1046_p10)
}
 0x2f4   : > { %797 = dma.vmem_to_hbm [thread:$0]  (%p1224_p0), %s578_s17, 128, %s580_s18, %s565_s25  }
 0x2f7   : > { %v561_v56 = vpop.f32.mrf.mxu1 }
 0x2f8 PF: > { %s591_s2 = sand.u32 1, %s1088_s21   ;;  %p1362_p12 = scmp.ge.s32.totalorder %s1100_s24, 2 }
 0x2f9   : > { %s592_s9 = scalar_lea.sflag [#allocation4], %s591_s2 }
 0x2fa   : > { %p817_p5 = pnand %p1362_p12, %p1230_p6 }
 0x2fc   : > { %p818_p11 = pneg %p817_p5 }
 0x2fe   : > { %1083 = dma.done.wait (%p818_p11), %s592_s9, 128  }
 0x2ff   : > { %1085 = vsyncadd (%p818_p11), %s592_s9, 4294967168  ;;  %s1363_s29 = sld [smem:[#allocation17_spill]]  ;;  %p23_p2 = scmp.ge.s32.totalorder %s1200_s30, 4  }
 0x300   : > { %s1364_s23 = sld [smem:[#allocation18_spill]]  ;;  %s1365_s21 = smov %s1092_s22 }
 0x301   : > { %s1367_s24 = smov %s1200_s30  ;;  %25 = sbr.rel (!%p23_p2) target bundleno = 12 (0xc), region = 114 }
 0x305   : > { %s1366_s22 = smov %s1363_s29 }
 0x306   :  { %598 = vsyncpa [#allocation3], 1 }
 0x307   :  { %600 = vsyncpa [#allocation3 + $0x1], 1 }
 0x308   :  { %601 = vsyncpa [#allocation6], 1 }
 0x309   :  { %603 = vsyncpa [#allocation6 + $0x1], 1 }
 0x30a   :  { %604 = vsyncpa [#allocation9], 1 }
 0x30b   :  { %605 = vsyncpa [#allocation4], 1 }
 0x30c   :  { %607 = vsyncpa [#allocation4 + $0x1], 1 }

</bundles_post_ra>
